<compile_context>
chip_gen: v7x
topology: tpu7x:2x2x1
jax: 0.10.0
libtpu: 0.0.40
codegen_flags: <defaults>
</compile_context>

<pallas_src>
import jax
import jax.numpy as jnp
from jax.experimental import pallas as pl
from jax.experimental.pallas import tpu as pltpu


def _make_kernel(dilation, Lb):
    dl = dilation % Lb            # left-tap shift: x[t-d] lands at lane t
    dr = (Lb - dl) % Lb           # right-tap shift: x[t+d] lands at lane t

    def kernel(x_ref, temb_ref, cond_ref, mask_ref, bmask_ref,
               w_time_ref, w_cond_ref, b_br_ref,
               w_dil_ref, b_dil_ref, w_1x1_ref, b_1x1_ref,
               out_ref):
        f32, bf16 = jnp.float32, jnp.bfloat16

        x = x_ref[...].astype(f32)                          # (C, Lb)

        # SiLU only on the time-embedding rows (EUP sigmoid in f32).
        te = temb_ref[...].astype(f32)                      # (Ctime, Lb)
        te_act = (te * jax.nn.sigmoid(te)).astype(bf16)

        # time / condition 1x1 convs on the MXU (f32 accumulation).
        br = (jnp.dot(w_time_ref[...], te_act, preferred_element_type=f32)
              + jnp.dot(w_cond_ref[...], cond_ref[...],
                        preferred_element_type=f32)
              + b_br_ref[...])
        x_new = x + br                                      # residual stream (f32)

        # Dilated k=3 conv: shifted operands via pltpu.roll (XLU) with the
        # boundary zeroing done as f32 multiplies by precomputed lane masks
        # (then cast to bf16 for the MXU).
        mL = bmask_ref[0:1, :]                              # 1 where t_in_sample >= d
        mR = bmask_ref[1:2, :]                              # 1 where t_in_sample < T-d
        xl = x_new if dl == 0 else pltpu.roll(x_new, shift=dl, axis=1)
        xr = x_new if dr == 0 else pltpu.roll(x_new, shift=dr, axis=1)
        xl = (xl * mL).astype(bf16)
        xr = (xr * mR).astype(bf16)
        xb = x_new.astype(bf16)

        # Three K=C matmuls accumulated in f32 (no (3C, L) materialization).
        acc = (jnp.dot(w_dil_ref[0], xl, preferred_element_type=f32)
               + jnp.dot(w_dil_ref[1], xb, preferred_element_type=f32)
               + jnp.dot(w_dil_ref[2], xr, preferred_element_type=f32)
               + b_dil_ref[...])
        h = jnp.maximum(acc, 0.0).astype(bf16)              # ReLU
        out = (jnp.dot(w_1x1_ref[...], h, preferred_element_type=f32)
               + b_1x1_ref[...])

        # dropout == identity (eval); residual; (1, Lb) mask broadcasts over C.
        out_ref[...] = ((x_new + out)
                        * mask_ref[...].astype(f32)).astype(out_ref.dtype)

    return kernel


def _pick_samples_per_step(N, T, C, Ctc, *, target_steps=4,
                           vmem_budget_bytes=8 << 20):
    """Largest nb (whole samples per grid step) such that the (·, nb*T) blocks
    are lane-aligned, the per-step VMEM working set stays within a budget that
    is safe on v7x (64 MiB VMEM) and v5e (16 MiB scoped default), and the grid
    keeps >= target_steps steps (>= 2 fallback) for megacore + DMA overlap."""
    # per-lane working set: double-buffered bf16 streams (in + out) plus the
    # f32/bf16 in-kernel intermediates (x_new, br/acc, relu, xl/xr + casts).
    bytes_per_lane = 4 * (2 * C + Ctc + 1) + 38 * C + 8
    max_lanes = max(128, vmem_budget_bytes // bytes_per_lane)
    divisors = [nb for nb in range(1, N + 1) if N % nb == 0]
    aligned = [nb for nb in divisors if (nb * T) % 128 == 0]
    for steps_req in (target_steps, 2):
        fits = [nb for nb in aligned
                if nb * T <= max_lanes and N // nb >= steps_req]
        if fits:
            return max(fits)
    fits = [nb for nb in aligned if nb * T <= max_lanes]
    if fits:
        return max(fits)
    if aligned:
        return min(aligned)
    return N   # full-array block (block_shape == array shape is always legal)


def condition_dilated_residual_layer_cm(x_cm, temb_cm, cond_cm, mask_cm,
                                        params, *, dilation, seq_len):
    """Channels-major core: activations are (channels, N*T) slabs (bf16).
    In a stacked UNet, call this per layer and do the NCT layout conversion
    only once at stack entry/exit."""
    f32, bf16 = jnp.float32, jnp.bfloat16
    C, L = x_cm.shape
    Ctime = temb_cm.shape[0]
    Ccond = cond_cm.shape[0]
    T = seq_len
    N = L // T
    assert N * T == L

    nb = _pick_samples_per_step(N, T, C, Ctime + Ccond)
    Lb = nb * T
    grid = (L // Lb,)

    # Per-lane boundary masks for the dilated taps; identical across grid
    # steps because every block holds whole samples contiguously on lanes.
    t_in_sample = jnp.arange(Lb, dtype=jnp.int32) % T
    bmask = jnp.stack([(t_in_sample >= dilation),
                       (t_in_sample < T - dilation)]).astype(f32)      # (2, Lb)

    # Weights: bf16 MXU operands, f32 biases. Fusing b_time + b_cond is valid
    # because both branches are always present and summed into the stream.
    w_time = params["w_time"].astype(bf16)                     # (C, Ctime)
    w_cond = params["w_cond"].astype(bf16)                     # (C, Ccond)
    b_br = (params["b_time"] + params["b_cond"]).astype(f32)   # (C, 1)
    w_dil = params["w_dil"].astype(bf16)                       # (3, C, C)
    b_dil = params["b_dil"].astype(f32)                        # (C, 1)
    w_1x1 = params["w_1x1"].astype(bf16)                       # (C, C)
    b_1x1 = params["b_1x1"].astype(f32)                        # (C, 1)

    def tile(ch):
        return pl.BlockSpec((ch, Lb), lambda i: (0, i))

    def full(shape):
        nd = len(shape)
        return pl.BlockSpec(shape, lambda i: (0,) * nd)

    flops = 2 * L * C * (Ctime + Ccond + 3 * C + C)
    bytes_accessed = (2 * (x_cm.size + temb_cm.size + cond_cm.size
                           + mask_cm.size + C * L)
                      + 2 * (w_time.size + w_cond.size + w_dil.size + w_1x1.size)
                      + 4 * (b_br.size + b_dil.size + b_1x1.size + bmask.size))
    cost = pl.CostEstimate(flops=int(flops),
                           transcendentals=int(L * Ctime),
                           bytes_accessed=int(bytes_accessed))

    return pl.pallas_call(
        _make_kernel(dilation, Lb),
        out_shape=jax.ShapeDtypeStruct((C, L), x_cm.dtype),
        grid_spec=pltpu.PrefetchScalarGridSpec(
            num_scalar_prefetch=0,
            grid=grid,
            in_specs=[
                tile(C),             # x                    (streamed, bf16)
                tile(Ctime),         # time embedding       (streamed, bf16)
                tile(Ccond),         # condition latents    (streamed, bf16)
                tile(1),             # mask[:, 0:1, :]      (streamed, bf16)
                full((2, Lb)),       # per-lane boundary masks (f32, resident)
                full((C, Ctime)),    # w_time
                full((C, Ccond)),    # w_cond
                full((C, 1)),        # b_time + b_cond
                full((3, C, C)),     # dilated-conv taps [W0, W1, W2]
                full((C, 1)),        # b_dil
                full((C, C)),        # conv_1x1 weight
                full((C, 1)),        # b_1x1
            ],
            out_specs=tile(C),
        ),
        compiler_params=pltpu.CompilerParams(
            dimension_semantics=("parallel",),
            vmem_limit_bytes=32 * 1024 * 1024),
        cost_estimate=cost,
    )(x_cm, temb_cm, cond_cm, mask_cm, bmask,
      w_time, w_cond, b_br, w_dil, b_dil, w_1x1, b_1x1)


def condition_dilated_residual_layer(x, cond, temb, mask, params, *, dilation,
                                     stream_dtype=jnp.bfloat16):
    """Standalone NCT entry point. The transpose/reshape here is one-time
    layout plumbing; a stacked UNet should do it once and call the _cm core
    per layer so each layer pays only one HBM read + one write."""
    N, C, T = x.shape
    x_cm = x.transpose(1, 0, 2).reshape(C, N * T).astype(stream_dtype)
    temb_cm = temb.transpose(1, 0, 2).reshape(temb.shape[1], N * T).astype(stream_dtype)
    cond_cm = cond.transpose(1, 0, 2).reshape(cond.shape[1], N * T).astype(stream_dtype)
    mask_cm = mask[:, 0:1, :].transpose(1, 0, 2).reshape(1, N * T).astype(stream_dtype)

    out_cm = condition_dilated_residual_layer_cm(
        x_cm, temb_cm, cond_cm, mask_cm, params, dilation=dilation, seq_len=T)
    return out_cm.reshape(C, N, T).transpose(1, 0, 2)


def ref_forward(x, cond, temb, mask, p, dilation):
    """Pure-JAX f32 reference replicating the PyTorch forward (dropout eval)."""
    d = dilation
    t_out = jnp.einsum("oi,nit->not", p["w_time"],
                       temb * jax.nn.sigmoid(temb)) + p["b_time"][None]
    c_out = jnp.einsum("oi,nit->not", p["w_cond"], cond) + p["b_cond"][None]
    x_new = x + t_out + c_out
    N, C, T = x_new.shape
    xp = jnp.pad(x_new, ((0, 0), (0, 0), (d, d)))
    acc = jnp.broadcast_to(p["b_dil"][None], (N, C, T))
    for k in range(3):
        acc = acc + jnp.einsum("oi,nit->not", p["w_dil"][k],
                               xp[:, :, k * d:k * d + T])
    out = jnp.maximum(acc, 0.0)
    out = jnp.einsum("oi,nit->not", p["w_1x1"], out) + p["b_1x1"][None]
    return (x_new + out) * mask[:, 0:1, :]


if __name__ == "__main__":
    # Small shapes consistent with the module: residual requires C_in == C_out.
    N, C, T = 2, 32, 128
    COND_DIM, TIME_DIM = 16, 16
    DILATION = 2

    key = jax.random.PRNGKey(0)
    ks = jax.random.split(key, 12)

    x = jax.random.normal(ks[0], (N, C, T), jnp.float32)
    condition_latents = jax.random.normal(ks[1], (N, COND_DIM, T), jnp.float32)
    time_embedding = jax.random.normal(ks[2], (N, TIME_DIM, T), jnp.float32)
    mask = (jax.random.uniform(ks[3], (N, C, T)) > 0.3).astype(jnp.float32)

    params = {
        # conv_dilated: Conv1d(C, C, 3, padding=d, dilation=d) -> (3, C_out, C_in)
        "w_dil": 0.1 * jax.random.normal(ks[4], (3, C, C), jnp.float32),
        "b_dil": 0.1 * jax.random.normal(ks[5], (C, 1), jnp.float32),
        # conv_1x1: Conv1d(C, C, 1)
        "w_1x1": 0.1 * jax.random.normal(ks[6], (C, C), jnp.float32),
        "b_1x1": 0.1 * jax.random.normal(ks[7], (C, 1), jnp.float32),
        # condition_embedding: Conv1d(condition_dim, C, 1)
        "w_cond": 0.1 * jax.random.normal(ks[8], (C, COND_DIM), jnp.float32),
        "b_cond": 0.1 * jax.random.normal(ks[9], (C, 1), jnp.float32),
        # time_embedding: Conv1d(time_embedding_dim, C, 1)
        "w_time": 0.1 * jax.random.normal(ks[10], (C, TIME_DIM), jnp.float32),
        "b_time": 0.1 * jax.random.normal(ks[11], (C, 1), jnp.float32),
    }

    out = condition_dilated_residual_layer(
        x, condition_latents, time_embedding, mask, params, dilation=DILATION)
    out = jax.block_until_ready(out)

    ref = ref_forward(x, condition_latents, time_embedding, mask, params, DILATION)
    assert out.shape == (N, C, T)
    # bf16 streamed activations / bf16 MXU operands (f32 accumulation).
    out_f32 = out.astype(jnp.float32)
    assert jnp.allclose(out_f32, ref, rtol=5e-2, atol=5e-2), (
        float(jnp.max(jnp.abs(out_f32 - ref))))

    print("KERNEL_OK")
</pallas_src>

<mosaic_0001>
module attributes {stable_mosaic.version = 11 : i64} {
  func.func @kernel(%arg0: i32, %arg1: memref<32x128xbf16, #tpu.memory_space<vmem>>, %arg2: memref<16x128xbf16, #tpu.memory_space<vmem>>, %arg3: memref<16x128xbf16, #tpu.memory_space<vmem>>, %arg4: memref<1x128xbf16, #tpu.memory_space<vmem>>, %arg5: memref<2x128xf32, #tpu.memory_space<vmem>>, %arg6: memref<32x16xbf16, #tpu.memory_space<vmem>>, %arg7: memref<32x16xbf16, #tpu.memory_space<vmem>>, %arg8: memref<32x1xf32, #tpu.memory_space<vmem>>, %arg9: memref<3x32x32xbf16, #tpu.memory_space<vmem>>, %arg10: memref<32x1xf32, #tpu.memory_space<vmem>>, %arg11: memref<32x32xbf16, #tpu.memory_space<vmem>>, %arg12: memref<32x1xf32, #tpu.memory_space<vmem>>, %arg13: memref<32x128xbf16, #tpu.memory_space<vmem>>) attributes {dimension_semantics = [#tpu.dimension_semantics<parallel>], iteration_bounds = array<i64: 2>, scalar_prefetch = 0 : i64, scratch_operands = 0 : i64, tpu.core_type = #tpu.core_type<tc>, window_params = [{transform_indices = @transform_0, window_bounds = array<i64: 32, 128>}, {transform_indices = @transform_1, window_bounds = array<i64: 16, 128>}, {transform_indices = @transform_2, window_bounds = array<i64: 16, 128>}, {transform_indices = @transform_3, window_bounds = array<i64: 1, 128>}, {pipeline_mode = #tpu.pipeline_mode<synchronous>, transform_indices = @transform_4, window_bounds = array<i64: 2, 128>}, {pipeline_mode = #tpu.pipeline_mode<synchronous>, transform_indices = @transform_5, window_bounds = array<i64: 32, 16>}, {pipeline_mode = #tpu.pipeline_mode<synchronous>, transform_indices = @transform_6, window_bounds = array<i64: 32, 16>}, {pipeline_mode = #tpu.pipeline_mode<synchronous>, transform_indices = @transform_7, window_bounds = array<i64: 32, 1>}, {pipeline_mode = #tpu.pipeline_mode<synchronous>, transform_indices = @transform_8, window_bounds = array<i64: 3, 32, 32>}, {pipeline_mode = #tpu.pipeline_mode<synchronous>, transform_indices = @transform_9, window_bounds = array<i64: 32, 1>}, {pipeline_mode = #tpu.pipeline_mode<synchronous>, transform_indices = @transform_10, window_bounds = array<i64: 32, 32>}, {pipeline_mode = #tpu.pipeline_mode<synchronous>, transform_indices = @transform_11, window_bounds = array<i64: 32, 1>}, {transform_indices = @transform_12, window_bounds = array<i64: 32, 128>}]} {
    %c0 = arith.constant 0 : index
    %c0_0 = arith.constant 0 : index
    %0 = vector.load %arg1[%c0, %c0_0] : memref<32x128xbf16, #tpu.memory_space<vmem>>, vector<32x128xbf16>
    %1 = arith.extf %0 : vector<32x128xbf16> to vector<32x128xf32>
    %c0_1 = arith.constant 0 : index
    %c0_2 = arith.constant 0 : index
    %2 = vector.load %arg2[%c0_1, %c0_2] : memref<16x128xbf16, #tpu.memory_space<vmem>>, vector<16x128xbf16>
    %3 = arith.extf %2 : vector<16x128xbf16> to vector<16x128xf32>
    %4 = arith.negf %3 : vector<16x128xf32>
    %5 = math.exp %4 : vector<16x128xf32>
    %cst = arith.constant 1.000000e+00 : f32
    %6 = vector.broadcast %cst : f32 to vector<16x128xf32>
    %7 = arith.addf %6, %5 : vector<16x128xf32>
    %8 = arith.divf %6, %7 : vector<16x128xf32>
    %9 = arith.mulf %3, %8 : vector<16x128xf32>
    %10 = arith.truncf %9 : vector<16x128xf32> to vector<16x128xbf16>
    %c0_3 = arith.constant 0 : index
    %c0_4 = arith.constant 0 : index
    %11 = vector.load %arg6[%c0_3, %c0_4] : memref<32x16xbf16, #tpu.memory_space<vmem>>, vector<32x16xbf16>
    %cst_5 = arith.constant dense<0.000000e+00> : vector<32x128xf32>
    %12 = tpu.matmul %11, %10, %cst_5 {dimension_numbers = #tpu.dot_dimension_numbers<[1], [0], [0], [1], [0, 0, 1, 1], [], []>} : vector<32x16xbf16>, vector<16x128xbf16>, vector<32x128xf32> -> vector<32x128xf32>
    %c0_6 = arith.constant 0 : index
    %c0_7 = arith.constant 0 : index
    %13 = vector.load %arg7[%c0_6, %c0_7] : memref<32x16xbf16, #tpu.memory_space<vmem>>, vector<32x16xbf16>
    %c0_8 = arith.constant 0 : index
    %c0_9 = arith.constant 0 : index
    %14 = vector.load %arg3[%c0_8, %c0_9] : memref<16x128xbf16, #tpu.memory_space<vmem>>, vector<16x128xbf16>
    %cst_10 = arith.constant dense<0.000000e+00> : vector<32x128xf32>
    %15 = tpu.matmul %13, %14, %cst_10 {dimension_numbers = #tpu.dot_dimension_numbers<[1], [0], [0], [1], [0, 0, 1, 1], [], []>} : vector<32x16xbf16>, vector<16x128xbf16>, vector<32x128xf32> -> vector<32x128xf32>
    %16 = arith.addf %12, %15 : vector<32x128xf32>
    %c0_11 = arith.constant 0 : index
    %c0_12 = arith.constant 0 : index
    %17 = vector.load %arg8[%c0_11, %c0_12] : memref<32x1xf32, #tpu.memory_space<vmem>>, vector<32x1xf32>
    %18 = vector.broadcast %17 : vector<32x1xf32> to vector<32x128xf32>
    %19 = arith.addf %16, %18 : vector<32x128xf32>
    %20 = arith.addf %1, %19 : vector<32x128xf32>
    %c0_13 = arith.constant 0 : index
    %c0_14 = arith.constant 0 : index
    %21 = vector.load %arg5[%c0_13, %c0_14] : memref<2x128xf32, #tpu.memory_space<vmem>>, vector<1x128xf32>
    %c1 = arith.constant 1 : index
    %c0_15 = arith.constant 0 : index
    %22 = vector.load %arg5[%c1, %c0_15] : memref<2x128xf32, #tpu.memory_space<vmem>>, vector<1x128xf32>
    %c2_i32 = arith.constant 2 : i32
    %23 = tpu.dynamic_rotate %20 by %c2_i32 dim 1 : vector<32x128xf32>, i32 -> vector<32x128xf32>
    %c126_i32 = arith.constant 126 : i32
    %24 = tpu.dynamic_rotate %20 by %c126_i32 dim 1 : vector<32x128xf32>, i32 -> vector<32x128xf32>
    %25 = vector.broadcast %21 : vector<1x128xf32> to vector<32x128xf32>
    %26 = arith.mulf %23, %25 : vector<32x128xf32>
    %27 = arith.truncf %26 : vector<32x128xf32> to vector<32x128xbf16>
    %28 = vector.broadcast %22 : vector<1x128xf32> to vector<32x128xf32>
    %29 = arith.mulf %24, %28 : vector<32x128xf32>
    %30 = arith.truncf %29 : vector<32x128xf32> to vector<32x128xbf16>
    %31 = arith.truncf %20 : vector<32x128xf32> to vector<32x128xbf16>
    %c0_16 = arith.constant 0 : index
    %c0_17 = arith.constant 0 : index
    %c0_18 = arith.constant 0 : index
    %32 = vector.load %arg9[%c0_16, %c0_17, %c0_18] : memref<3x32x32xbf16, #tpu.memory_space<vmem>>, vector<1x32x32xbf16>
    %33 = vector.shape_cast %32 : vector<1x32x32xbf16> to vector<32x32xbf16>
    %cst_19 = arith.constant dense<0.000000e+00> : vector<32x128xf32>
    %34 = tpu.matmul %33, %27, %cst_19 {dimension_numbers = #tpu.dot_dimension_numbers<[1], [0], [0], [1], [0, 0, 1, 1], [], []>} : vector<32x32xbf16>, vector<32x128xbf16>, vector<32x128xf32> -> vector<32x128xf32>
    %c1_20 = arith.constant 1 : index
    %c0_21 = arith.constant 0 : index
    %c0_22 = arith.constant 0 : index
    %35 = vector.load %arg9[%c1_20, %c0_21, %c0_22] : memref<3x32x32xbf16, #tpu.memory_space<vmem>>, vector<1x32x32xbf16>
    %36 = vector.shape_cast %35 : vector<1x32x32xbf16> to vector<32x32xbf16>
    %cst_23 = arith.constant dense<0.000000e+00> : vector<32x128xf32>
    %37 = tpu.matmul %36, %31, %cst_23 {dimension_numbers = #tpu.dot_dimension_numbers<[1], [0], [0], [1], [0, 0, 1, 1], [], []>} : vector<32x32xbf16>, vector<32x128xbf16>, vector<32x128xf32> -> vector<32x128xf32>
    %38 = arith.addf %34, %37 : vector<32x128xf32>
    %c2 = arith.constant 2 : index
    %c0_24 = arith.constant 0 : index
    %c0_25 = arith.constant 0 : index
    %39 = vector.load %arg9[%c2, %c0_24, %c0_25] : memref<3x32x32xbf16, #tpu.memory_space<vmem>>, vector<1x32x32xbf16>
    %40 = vector.shape_cast %39 : vector<1x32x32xbf16> to vector<32x32xbf16>
    %cst_26 = arith.constant dense<0.000000e+00> : vector<32x128xf32>
    %41 = tpu.matmul %40, %30, %cst_26 {dimension_numbers = #tpu.dot_dimension_numbers<[1], [0], [0], [1], [0, 0, 1, 1], [], []>} : vector<32x32xbf16>, vector<32x128xbf16>, vector<32x128xf32> -> vector<32x128xf32>
    %42 = arith.addf %38, %41 : vector<32x128xf32>
    %c0_27 = arith.constant 0 : index
    %c0_28 = arith.constant 0 : index
    %43 = vector.load %arg10[%c0_27, %c0_28] : memref<32x1xf32, #tpu.memory_space<vmem>>, vector<32x1xf32>
    %44 = vector.broadcast %43 : vector<32x1xf32> to vector<32x128xf32>
    %45 = arith.addf %42, %44 : vector<32x128xf32>
    %cst_29 = arith.constant 0.000000e+00 : f32
    %46 = vector.broadcast %cst_29 : f32 to vector<32x128xf32>
    %47 = arith.maximumf %45, %46 : vector<32x128xf32>
    %48 = arith.truncf %47 : vector<32x128xf32> to vector<32x128xbf16>
    %c0_30 = arith.constant 0 : index
    %c0_31 = arith.constant 0 : index
    %49 = vector.load %arg11[%c0_30, %c0_31] : memref<32x32xbf16, #tpu.memory_space<vmem>>, vector<32x32xbf16>
    %cst_32 = arith.constant dense<0.000000e+00> : vector<32x128xf32>
    %50 = tpu.matmul %49, %48, %cst_32 {dimension_numbers = #tpu.dot_dimension_numbers<[1], [0], [0], [1], [0, 0, 1, 1], [], []>} : vector<32x32xbf16>, vector<32x128xbf16>, vector<32x128xf32> -> vector<32x128xf32>
    %c0_33 = arith.constant 0 : index
    %c0_34 = arith.constant 0 : index
    %51 = vector.load %arg12[%c0_33, %c0_34] : memref<32x1xf32, #tpu.memory_space<vmem>>, vector<32x1xf32>
    %52 = vector.broadcast %51 : vector<32x1xf32> to vector<32x128xf32>
    %53 = arith.addf %50, %52 : vector<32x128xf32>
    %54 = arith.addf %20, %53 : vector<32x128xf32>
    %c0_35 = arith.constant 0 : index
    %c0_36 = arith.constant 0 : index
    %55 = vector.load %arg4[%c0_35, %c0_36] : memref<1x128xbf16, #tpu.memory_space<vmem>>, vector<1x128xbf16>
    %56 = arith.extf %55 : vector<1x128xbf16> to vector<1x128xf32>
    %57 = vector.broadcast %56 : vector<1x128xf32> to vector<32x128xf32>
    %58 = arith.mulf %54, %57 : vector<32x128xf32>
    %59 = arith.truncf %58 : vector<32x128xf32> to vector<32x128xbf16>
    %c0_37 = arith.constant 0 : index
    %c0_38 = arith.constant 0 : index
    %60 = vector.load %arg13[%c0_37, %c0_38] : memref<32x128xbf16, #tpu.memory_space<vmem>>, vector<32x128xbf16>
    tpu.vector_store %arg13[%c0_37, %c0_38], %59 {strides = array<i32>} : memref<32x128xbf16, #tpu.memory_space<vmem>>, vector<32x128xbf16>,
    return
  }
  func.func @transform_0(%arg0: i32) -> (i32, i32) {
    %c0_i32 = arith.constant 0 : i32
    %c0_i32_0 = arith.constant 0 : i32
    return %c0_i32, %arg0 : i32, i32
  }
  func.func @transform_1(%arg0: i32) -> (i32, i32) {
    %c0_i32 = arith.constant 0 : i32
    %c0_i32_0 = arith.constant 0 : i32
    return %c0_i32, %arg0 : i32, i32
  }
  func.func @transform_2(%arg0: i32) -> (i32, i32) {
    %c0_i32 = arith.constant 0 : i32
    %c0_i32_0 = arith.constant 0 : i32
    return %c0_i32, %arg0 : i32, i32
  }
  func.func @transform_3(%arg0: i32) -> (i32, i32) {
    %c0_i32 = arith.constant 0 : i32
    %c0_i32_0 = arith.constant 0 : i32
    return %c0_i32, %arg0 : i32, i32
  }
  func.func @transform_4(%arg0: i32) -> (i32, i32) {
    %c0_i32 = arith.constant 0 : i32
    %c0_i32_0 = arith.constant 0 : i32
    %c0_i32_1 = arith.constant 0 : i32
    return %c0_i32, %c0_i32_0 : i32, i32
  }
  func.func @transform_5(%arg0: i32) -> (i32, i32) {
    %c0_i32 = arith.constant 0 : i32
    %c0_i32_0 = arith.constant 0 : i32
    %c0_i32_1 = arith.constant 0 : i32
    return %c0_i32, %c0_i32_0 : i32, i32
  }
  func.func @transform_6(%arg0: i32) -> (i32, i32) {
    %c0_i32 = arith.constant 0 : i32
    %c0_i32_0 = arith.constant 0 : i32
    %c0_i32_1 = arith.constant 0 : i32
    return %c0_i32, %c0_i32_0 : i32, i32
  }
  func.func @transform_7(%arg0: i32) -> (i32, i32) {
    %c0_i32 = arith.constant 0 : i32
    %c0_i32_0 = arith.constant 0 : i32
    %c0_i32_1 = arith.constant 0 : i32
    return %c0_i32, %c0_i32_0 : i32, i32
  }
  func.func @transform_8(%arg0: i32) -> (i32, i32, i32) {
    %c0_i32 = arith.constant 0 : i32
    %c0_i32_0 = arith.constant 0 : i32
    %c0_i32_1 = arith.constant 0 : i32
    %c0_i32_2 = arith.constant 0 : i32
    return %c0_i32, %c0_i32_0, %c0_i32_1 : i32, i32, i32
  }
  func.func @transform_9(%arg0: i32) -> (i32, i32) {
    %c0_i32 = arith.constant 0 : i32
    %c0_i32_0 = arith.constant 0 : i32
    %c0_i32_1 = arith.constant 0 : i32
    return %c0_i32, %c0_i32_0 : i32, i32
  }
  func.func @transform_10(%arg0: i32) -> (i32, i32) {
    %c0_i32 = arith.constant 0 : i32
    %c0_i32_0 = arith.constant 0 : i32
    %c0_i32_1 = arith.constant 0 : i32
    return %c0_i32, %c0_i32_0 : i32, i32
  }
  func.func @transform_11(%arg0: i32) -> (i32, i32) {
    %c0_i32 = arith.constant 0 : i32
    %c0_i32_0 = arith.constant 0 : i32
    %c0_i32_1 = arith.constant 0 : i32
    return %c0_i32, %c0_i32_0 : i32, i32
  }
  func.func @transform_12(%arg0: i32) -> (i32, i32) {
    %c0_i32 = arith.constant 0 : i32
    %c0_i32_0 = arith.constant 0 : i32
    return %c0_i32, %arg0 : i32, i32
  }
}

</mosaic_0001>

<bundles_post_ra>
// kernel: tpu_custom_call.1
= control target key start
LH: loop header
LB: loop body
LE: loop exit
PB: predicated region body
PF: predicated region fallthrough
CT: control target
= control target key end

     0   :  { %s1981_s0 = inlined_call_operand.vmem [shape: bf16[32,256], index: 0, kind: input, shape index: {}]   ;;  %s1982_s1 = inlined_call_operand.vmem [shape: bf16[16,256], index: 1, kind: input, shape index: {}]   ;;  %s1983_s2 = inlined_call_operand.vmem [shape: bf16[16,256], index: 2, kind: input, shape index: {}]   ;;  %s1984_s3 = inlined_call_operand.vmem [shape: bf16[1,256], index: 3, kind: input, shape index: {}]   ;;  %s1985_s4 = inlined_call_operand.vmem [shape: f32[2,128], index: 4, kind: input, shape index: {}]   ;;  %s1986_s5 = inlined_call_operand.vmem [shape: bf16[32,16], index: 5, kind: input, shape index: {}]   ;;  %s1987_s6 = inlined_call_operand.vmem [shape: bf16[32,16], index: 6, kind: input, shape index: {}]   ;;  %s1988_s7 = inlined_call_operand.vmem [shape: f32[32,1], index: 7, kind: input, shape index: {}]   ;;  %s1989_s8 = inlined_call_operand.vmem [shape: bf16[3,32,32], index: 8, kind: input, shape index: {}]   ;;  %s1990_s9 = inlined_call_operand.vmem [shape: f32[32,1], index: 9, kind: input, shape index: {}]   ;;  %s1991_s10 = inlined_call_operand.vmem [shape: bf16[32,32], index: 10, kind: input, shape index: {}]   ;;  %s1992_s11 = inlined_call_operand.vmem [shape: f32[32,1], index: 11, kind: input, shape index: {}]   ;;  %s1993_s12 = inlined_call_operand.hbm [shape: bf16[32,256], index: 12, kind: output, shape index: {}]  }
   0x1   :  { %1997 = sst [smem:[#allocation11_spill]] %s1981_s0 }
   0x2   :  { %17 = vsyncpa [#allocation6], 0 }
   0x3   :  { %19 = vsyncpa [#allocation6 + $0x1], 0  ;;  %s1726_s21 = smov 0   ;;  %s1728_s22 = smov 0  }
   0x4   :  { %s1730_s23 = smov 0   ;;  %s1732_s24 = smov 0  }
   0x5 LB: > { %s1747_s25 = sadd.s32 4294967295, %s1652_s24   ;;  %s1357_s26 = sadd.s32 4294967294, %s1652_s24   ;;  %s1652_s24 = sphi %s1732_s24, %s2006_s24   ;;  %s1648_s23 = sphi %s1730_s23, %s2010_s23   ;;  %s1644_s22 = sphi %s1728_s22, %s2009_s22   ;;  %s1640_s21 = sphi %s1726_s21, %s2008_s21  }
   0x6   : > { %s1751_s27 = sadd.s32 1, %s1652_s24   ;;  %s32_s28 = sadd.s32 1, %s1648_s23 }
   0x7   : > { %1998 = sst [smem:[#allocation8_spill]] %s1751_s27  ;;  %s29_s29 = ssub.s32 %s1652_s24, %s1751_s27 }
   0x8   : > { %p39_p0 = scmp.ne.s32.totalorder %s1648_s23, %s1644_s22  ;;  %p30_p1 = scmp.eq.s32.totalorder %s29_s29, 0 }
   0x9   : > { %p40_p2 = scmp.eq.s32.totalorder %s1652_s24, 0  ;;  %p315_p3 = scmp.eq.s32.totalorder %s1747_s25, 1 }
   0xa   : > { %p320_p4 = scmp.ne.s32.totalorder %s1644_s22, %s1640_s21  ;;  %p321_p7 = scmp.eq.s32.totalorder %s1357_s26, 1 }
   0xb   : > { %s1763_s30 = scalar_select %p30_p1, %s1648_s23, %s32_s28  }
   0xc   : > { %p1765_p5 = por %p40_p2, %p39_p0  ;;  %p1769_p6 = por %p315_p3, %p39_p0 }
   0xd   : > { %1999 = sst [smem:[#allocation9_spill]] %s1763_s30  ;;  %p1773_p8 = por %p321_p7, %p320_p4 }
   0xe   : > { %p1359_p9 = scmp.ge.s32.totalorder %s1652_s24, 2 }
   0xf   : > { %s2002_s15 = scalar_select %p1773_p8, 1, 0 }
  0x10   : > { %361 = sbr.rel (%p1359_p9) target bundleno = 49 (0x31), region = 48 }
  0x11   : > { %2003 = sst [smem:[#allocation10_spill]] %s2002_s15 }
  0x17   : > { %364 = sbr.rel (!%p1765_p5) target bundleno = 35 (0x23), region = 52  ;;  %s366_s16 = sand.u32 (%p1765_p5), 1, %s1648_s23  }
  0x18   : > { %s1361_s17 = sshll.u32 (%p1765_p5), %s1652_s24, 2  ;;  %s1360_s18 = sshll.u32 (%p1765_p5), %s366_s16, 4 }
  0x19   : > { %s2004_s0 = sld [smem:[#allocation11_spill]] (%p1765_p5)  ;;  %s368_s28 = scalar_lea.vmem (%p1765_p5), [#allocation2], %s1360_s18 }
  0x1f   : > { %s370_s26 = scalar_lea.vmem %s2004_s0, %s1361_s17 }
  0x20   : > { %v386_v0 = vld [vmem:[%s370_s26] sm:$0xf]  ;;  %v388_v1 = vld [vmem:[%s370_s26 + $0x8] sm:$0xf]  ;;  %v390_v2 = vld [vmem:[%s370_s26 + $0x10] sm:$0xf] }
  0x21   : > { %387 = vst [vmem:[%s368_s28] sm:$0xf] %v386_v0  ;;  %389 = vst [vmem:[%s368_s28 + $0x4] sm:$0xf] %v388_v1  ;;  %v392_v3 = vld [vmem:[%s370_s26 + $0x18] sm:$0xf] }
  0x22   : > { %391 = vst [vmem:[%s368_s28 + $0x8] sm:$0xf] %v390_v2  ;;  %393 = vst [vmem:[%s368_s28 + $0xc] sm:$0xf] %v392_v3 }
  0x23 PF: > { %424 = sbr.rel (!%p1765_p5) target bundleno = 42 (0x2a), region = 93  ;;  %s426_s29 = sand.u32 (%p1765_p5), 1, %s1648_s23  }
  0x24   : > { %s1363_s16 = sshll.u32 (%p1765_p5), %s1652_s24, 2  ;;  %s1362_s30 = sshll.u32 (%p1765_p5), %s426_s29, 3 }
  0x25   : > { %s430_s20 = scalar_lea.vmem (%p1765_p5), %s1982_s1, %s1363_s16  ;;  %s428_s18 = scalar_lea.vmem (%p1765_p5), [#allocation3], %s1362_s30 }
  0x26   : > { %v446_v4 = vld [vmem:[%s430_s20] sm:$0xf] (%p1765_p5)  ;;  %v448_v5 = vld [vmem:[%s430_s20 + $0x8] sm:$0xf] (%p1765_p5) }
  0x27   : > { %447 = vst [vmem:[%s428_s18] sm:$0xf] (%p1765_p5), %v446_v4  ;;  %449 = vst [vmem:[%s428_s18 + $0x4] sm:$0xf] (%p1765_p5), %v448_v5 }
  0x2a PF: > { %476 = sbr.rel (!%p1765_p5) target bundleno = 49 (0x31), region = 134  ;;  %s478_s26 = sand.u32 (%p1765_p5), 1, %s1648_s23  }
  0x2b   : > { %s1365_s28 = sshll.u32 (%p1765_p5), %s1652_s24, 2  ;;  %s1364_s0 = sshll.u32 (%p1765_p5), %s478_s26, 3 }
  0x2c   : > { %s482_s15 = scalar_lea.vmem (%p1765_p5), %s1983_s2, %s1365_s28  ;;  %s480_s16 = scalar_lea.vmem (%p1765_p5), [#allocation4], %s1364_s0 }
  0x2d   : > { %v498_v6 = vld [vmem:[%s482_s15] sm:$0xf] (%p1765_p5)  ;;  %v500_v7 = vld [vmem:[%s482_s15 + $0x8] sm:$0xf] (%p1765_p5) }
  0x2e   : > { %499 = vst [vmem:[%s480_s16] sm:$0xf] (%p1765_p5), %v498_v6  ;;  %501 = vst [vmem:[%s480_s16 + $0x4] sm:$0xf] (%p1765_p5), %v500_v7 }
  0x31 PF: > { %p1366_p10 = scmp.ge.s32.totalorder %s1652_s24, 1  ;;  %p533_p11 = scmp.lt.s32.totalorder %s1652_s24, 3 }
  0x33   : > { %p534_p12 = pnand %p1366_p10, %p533_p11 }
  0x34   : > { %s1804_s30 = sand.u32 (!%p534_p12), 1, %s1644_s22   ;;  %v1570_v8 = vld [vmem:[%s1987_s6] sm:$0xff] (!%p534_p12)   ;;  %vm663_vm0 = vcmask (!%p534_p12), 130048   ;;  %v1654_v13 = vmov (!%p534_p12), 0   ;;  %v1571_v14 = vld [vmem:[%s1987_s6 + $0x8] sm:$0xff] (!%p534_p12)   ;;  %v786_v17 = vld [vmem:[%s1988_s7 + $0x10] sm:$0xff] (!%p534_p12) }
  0x35   : > { %537 = sbr.rel (%p534_p12) target bundleno = 919 (0x397), region = 179  ;;  %s1368_s27 = sshll.u32 (!%p534_p12), %s1804_s30, 3  ;;  %1468 = vmatprep.mubr.msk.bf16.mxu0 (!%p534_p12), %vm663_vm0, %v1570_v8  ;;  %1568 = vset.pattern.permute.xlu1 (!%p534_p12), %v1654_v13  ;;  %v784_v18 = vld [vmem:[%s1988_s7] sm:$0xff] (!%p534_p12)  ;;  %v787_v20 = vld [vmem:[%s1988_s7 + $0x18] sm:$0xff] (!%p534_p12)  ;;  %v785_v21 = vld [vmem:[%s1988_s7 + $0x8] sm:$0xff] (!%p534_p12)  ;;  %vm875_vm1 = vcmask (!%p534_p12), 261120  }
  0x36   : > { %s549_s0 = scalar_lea.vmem (!%p534_p12), [#allocation3], %s1368_s27  ;;  %s556_s15 = scalar_lea.vmem (!%p534_p12), [#allocation4], %s1368_s27  ;;  %1567 = vset.pattern.permute.xlu0 (!%p534_p12), %v1654_v13  ;;  %v1572_v19 = vld [vmem:[%s1986_s5] sm:$0xff] (!%p534_p12)   ;;  %800 = vperm.xlu1 (!%p534_p12), %1568, %v786_v17   ;;  %v1573_v31 = vld [vmem:[%s1986_s5 + $0x8] sm:$0xff] (!%p534_p12)   ;;  %v1574_v32 = vld [vmem:[%s1989_s8 + $0x10] sm:$0xff] (!%p534_p12)  }
  0x37   : > { %v1429_v9 = vld [vmem:[%s549_s0] sm:$0xff] (!%p534_p12)   ;;  %v1569_v12 = vld [vmem:[%s556_s15] sm:$0xff] (!%p534_p12)   ;;  %790 = vperm.xlu0 (!%p534_p12), %1567, %v784_v18   ;;  %s1367_s18 = sshll.u32 (!%p534_p12), %s1804_s30, 4  ;;  %1482 = vmatprep.mubr.msk.bf16.mxu1 (!%p534_p12), %vm875_vm1, %v1574_v32  ;;  %s1655_s16 = smov (!%p534_p12), 2  }
  0x38   : > { %v1430_v10 = vunpack.c.l.bf16 (!%p534_p12), %v1429_v9  ;;  %v1431_v11 = vunpack.c.h.bf16 (!%p534_p12), %v1429_v9  ;;  %1466 = vmatprep.subr.bf16.mxu0 (!%p534_p12), %v1569_v12  ;;  %s542_s29 = scalar_lea.vmem (!%p534_p12), [#allocation2], %s1367_s18  ;;  %s1656_s13 = smov (!%p534_p12), 126   ;;  %v1575_v57 = vld [vmem:[%s1989_s8 + $0x18] sm:$0xff] (!%p534_p12)   ;;  %v1576_v58 = vld [vmem:[%s1989_s8] sm:$0xff] (!%p534_p12)   ;;  %v1071_v60 = vld [vmem:[%s1990_s9 + $0x8] sm:$0xff] (!%p534_p12) }
  0x39   : > { %1467 = vmatpush3.bf16.msra.mxu0 (!%p534_p12), %v1569_v12  ;;  %v1442_v34 = vld [vmem:[%s542_s29 + $0x8] sm:$0xff] (!%p534_p12)   ;;  %v1421_v36 = vld [vmem:[%s542_s29] sm:$0xff] (!%p534_p12)   ;;  %p606_p13 = scmp.lt.s32.totalorder (!%p534_p12), %s1747_s25, 1  ;;  %s605_s20 = scalar_lea.vmem (!%p534_p12), [#allocation5], %s1367_s18 }
  0x3a   : > { %v1371_v15 = vmul.f32 (!%p534_p12), -1.442695, %v1430_v10  ;;  %v1372_v16 = vmul.f32 (!%p534_p12), -1.442695, %v1431_v11  ;;  %805 = vperm.xlu1 (!%p534_p12), %1568, %v787_v20   ;;  %v1426_v37 = vunpack.c.l.bf16 (!%p534_p12), %v1442_v34  ;;  %v1422_v39 = vunpack.c.l.bf16 (!%p534_p12), %v1421_v36  ;;  %v1070_v59 = vld [vmem:[%s1990_s9] sm:$0xff] (!%p534_p12)  ;;  %v1072_v61 = vld [vmem:[%s1990_s9 + $0x10] sm:$0xff] (!%p534_p12) }
  0x3b   : > { %795 = vperm.xlu0 (!%p534_p12), %1567, %v785_v21   ;;  %v1427_v43 = vunpack.c.h.bf16 (!%p534_p12), %v1442_v34  ;;  %v1423_v46 = vunpack.c.h.bf16 (!%p534_p12), %v1421_v36  ;;  %v1073_v62 = vld [vmem:[%s1990_s9 + $0x18] sm:$0xff] (!%p534_p12)  ;;  %v1108_v63 = vld [vmem:[%s1992_s11] sm:$0xff] (!%p534_p12)  ;;  %v1109_v0 = vld [vmem:[%s1992_s11 + $0x8] sm:$0xff] (!%p534_p12)  ;;  %s1244_s26 = sshll.u32 (!%p534_p12), %s605_s20, 4  ;;  %s1413_s28 = sshll.u32 (!%p534_p12), %s1747_s25, 6  ;;  %s1932_s26 = int_to_ptr.vmem [resolvable:$true] %s1244_s26 }
  0x3c   : > { %1582 = vpow2.f32 %v1371_v15  ;;  %1469 = vmatmul.mubr.msk.bf16.vlgmr.msra.gmra.mrb[0].mxu0 %vm663_vm0, %v1571_v14  ;;  %v1110_v1 = vld [vmem:[%s1992_s11 + $0x10] sm:$0xff]  ;;  %v1111_v2 = vld [vmem:[%s1992_s11 + $0x18] sm:$0xff]  ;;  %v1382_v3 = vld [vmem:[%s1985_s4] ss:$0 sm:$0xff]  ;;  %s607_s0 = scalar_select %p606_p13, %s1747_s25, 1 }
  0x3d   : > { %1584 = vpow2.f32 %v1372_v16  ;;  %1474 = vmatprep.mubr.msk.bf16.mxu0 %vm663_vm0, %v1572_v19  ;;  %v1383_v13 = vld [vmem:[%s1985_s4 + $0x1] ss:$0 sm:$0xff]  ;;  %v1577_v19 = vld [vmem:[%s1989_s8 + $0x8] sm:$0xff]   ;;  %s1937_s18 = scalar_lea.hbm %s1993_s12, %s1413_s28  ;;  %s1232_s19 = scalar_lea.sflag [#allocation6], %s1804_s30 }
  0x3e   : > { %v1578_v21 = vld [vmem:[%s1989_s8 + $0x20] sm:$0xff]   ;;  %s608_s17 = scalar_lea.vmem %s1984_s3, %s607_s0  ;;  %s1590_s25 = scalar_lea.vmem %s1932_s26, 256 }
  0x3f   : > { %p1591_p0 = scmp.ne.s32.totalorder %s1932_s26, %s1590_s25  ;;  %s1657_s27 = smov [#allocation5]  }
  0x40   : > { %s1594_s0 = sshll.u32 %s1657_s27, 4  ;;  %s1595_s0 = int_to_ptr.vmem [resolvable:$false] %s1594_s0 }
  0x41   : > { %p1592_p1 = pnand %p1591_p0, %p1769_p6  ;;  %s1596_s15 = scalar_lea.vmem %s1595_s0, 512 }
  0x42   : > { %p1597_p3 = scmp.lt.s32.totalorder %s1932_s26, %s1595_s0  ;;  %p1598_p4 = scmp.lt.s32.totalorder %s1596_s15, %s1590_s25 }
  0x43   : > { %p1593_p2 = pneg %p1592_p1 }
  0x44   : > { %p1599_p5 = por %p1598_p4, %p1597_p3 }
  0x46   : > { %v1583_v22 = vpop.eup %1582  ;;  %p1600_p7 = pnand %p1599_p5, %p1593_p2 }
  0x47   : > { %v1585_v23 = vpop.eup %1584  ;;  %v628_v24 = vadd.f32 1.0, %v1583_v22 }
  0x48   : > { %v629_v25 = vadd.f32 1.0, %v1585_v23 }
  0x49   : > { %1586 = vrcp.f32 %v628_v24 }
  0x4a   : > { %1588 = vrcp.f32 %v629_v25 }
  0x53   : > { %v1587_v26 = vpop.eup %1586 }
  0x54   : > { %v1589_v27 = vpop.eup %1588  ;;  %v634_v28 = vmul.f32 %v1587_v26, %v1430_v10 }
  0x55   : > { %v635_v29 = vmul.f32 %v1589_v27, %v1431_v11  ;;  %v1579_v27 = vld [vmem:[%s1989_s8 + $0x28] sm:$0xff]  }
  0x57   : > { %v636_v30 = vpack.c.bf16 %v635_v29, %v634_v28  ;;  %v1580_v28 = vld [vmem:[%s1991_s10] sm:$0xff]  }
  0x59   : > { %1472 = vmatprep.subr.bf16.mxu0 %v636_v30 }
  0x5a   : > { %1473 = vmatpush3.bf16.msra.mxu0 %v636_v30 }
  0x5d   : > { %1475 = vmatmul.mubr.msk.bf16.vlgmr.msra.gmra.mrb[0].mxu0 %vm663_vm0, %v1573_v31 }
  0x5e   : > { %1506 = vmatprep.mubr.msk.bf16.mxu0 %vm875_vm1, %v1580_v28 }
  0xb5   : > { %v801_v33 = vpop.permute.xlu1 %800 }
  0xb6   : > { %v791_v35 = vpop.permute.xlu0 %790 }
  0xb9   : > { %v806_v40 = vpop.permute.xlu1 %805 }
  0xba   : > { %v796_v49 = vpop.permute.xlu0 %795 }
 0x130   : > { %v1476_v38 = vpop.f32.mrb[0].mxu0 }
 0x131   : > { %v810_v41 = vadd.f32 %v1476_v38, %v801_v33  ;;  %v769_v42 = vpop.f32.mrb[1].mxu0 }
 0x132   : > { %v808_v44 = vadd.f32 %v791_v35, %v769_v42  ;;  %v1477_v45 = vpop.f32.mrb[2].mxu0 }
 0x133   : > { %v1842_v47 = vadd.f32 %v1426_v37, %v810_v41  ;;  %v811_v48 = vadd.f32 %v1477_v45, %v806_v40  ;;  %v772_v50 = vpop.f32.mrb[3].mxu0 }
 0x134   : > { %v1844_v51 = vadd.f32 %v1422_v39, %v808_v44  ;;  %v809_v52 = vadd.f32 %v796_v49, %v772_v50  ;;  %v1203_v49 = vlaneseq }
 0x135   : > { %v1846_v53 = vadd.f32 %v1427_v43, %v811_v48  ;;  %v1581_v48 = vld [vmem:[%s1991_s10 + $0x8] sm:$0xff]  }
 0x136   : > { %v1848_v54 = vadd.f32 %v1423_v46, %v809_v52  ;;  %818 = vrot.lane.b32.xlu0 %v1844_v51, %s1655_s16  ;;  %v1204_v52 = vshrl.u32 %v1203_v49, 7 }
 0x137   : > { %v855_v56 = vpack.c.bf16 %v1846_v53, %v1842_v47 }
 0x138   : > { %820 = vrot.lane.b32.xlu1 %v1848_v54, %s1655_s16  ;;  %v854_v55 = vpack.c.bf16 %v1848_v54, %v1844_v51 }
 0x13a   : > { %822 = vrot.lane.b32.xlu0 %v1842_v47, %s1655_s16  ;;  %1478 = vmatprep.subr.bf16.mxu1 %v854_v55 }
 0x13b   : > { %1479 = vmatpush3.bf16.msra.mxu1 %v854_v55 }
 0x13c   : > { %824 = vrot.lane.b32.xlu1 %v1846_v53, %s1655_s16  ;;  %1480 = vmatprep.subr.bf16.mxu1 %v855_v56 }
 0x13e   : > { %826 = vrot.lane.b32.xlu0 %v1844_v51, %s1656_s13 }
 0x13f   : > { %1481 = vmatpush3.bf16.msra.mxu1 %v855_v56  ;;  %v1201_v56 = vld [vmem:[%s608_s17] sm:$0x1] }
 0x140   : > { %828 = vrot.lane.b32.xlu1 %v1848_v54, %s1656_s13 }
 0x142   : > { %830 = vrot.lane.b32.xlu0 %v1842_v47, %s1656_s13  ;;  %1483 = vmatmul.mubr.msk.bf16.vlgmr.msra.gmra.mrb[0].mxu1 %vm875_vm1, %v1575_v57  ;;  %v1202_v57 = vunpack.c.l.bf16 %v1201_v56 }
 0x143   : > { %1490 = vmatprep.mubr.msk.bf16.mxu1 %vm875_vm1, %v1576_v58  ;;  %v1205_v58 = vsub.s32 0, %v1204_v52 }
 0x144   : > { %832 = vrot.lane.b32.xlu1 %v1846_v53, %s1656_s13 }
 0x146   : > { %1076 = vperm.xlu0 %1567, %v1070_v59  }
 0x148   : > { %1081 = vperm.xlu1 %1568, %v1071_v60  }
 0x14a   : > { %1086 = vperm.xlu0 %1567, %v1072_v61  }
 0x14c   : > { %1091 = vperm.xlu1 %1568, %v1073_v62  }
 0x14e   : > { %1114 = vperm.xlu0 %1567, %v1108_v63  }
 0x150   : > { %1119 = vperm.xlu1 %1568, %v1109_v0  }
 0x152   : > { %1124 = vperm.xlu0 %1567, %v1110_v1  }
 0x154   : > { %1129 = vperm.xlu1 %1568, %v1111_v2  }
 0x1a8   : > { %v819_v4 = vpop.permute.xlu0 %818 }
 0x1a9   : > { %v838_v6 = vmul.f32 %v1382_v3, %v819_v4 }
 0x1aa   : > { %v821_v5 = vpop.permute.xlu1 %820 }
 0x1ab   : > { %v839_v7 = vmul.f32 %v1382_v3, %v821_v5 }
 0x1ac   : > { %v823_v8 = vpop.permute.xlu0 %822 }
 0x1ad   : > { %v842_v9 = vpack.c.bf16 %v839_v7, %v838_v6  ;;  %v840_v11 = vmul.f32 %v1382_v3, %v823_v8 }
 0x1ae   : > { %v825_v10 = vpop.permute.xlu1 %824 }
 0x1af   : > { %v841_v12 = vmul.f32 %v1382_v3, %v825_v10  ;;  %1486 = vmatprep.subr.bf16.mxu1 %v842_v9  ;;  %v1206_v3 = vrot.slane %v1202_v57, %v1205_v58 }
 0x1b0   : > { %v827_v14 = vpop.permute.xlu0 %826  ;;  %1487 = vmatpush3.bf16.msra.mxu1 %v842_v9 }
 0x1b1   : > { %v843_v15 = vpack.c.bf16 %v841_v12, %v840_v11  ;;  %v848_v17 = vmul.f32 %v1383_v13, %v827_v14 }
 0x1b2   : > { %v829_v16 = vpop.permute.xlu1 %828 }
 0x1b3   : > { %v849_v18 = vmul.f32 %v1383_v13, %v829_v16  ;;  %1488 = vmatprep.subr.bf16.mxu1 %v843_v15 }
 0x1b4   : > { %v831_v20 = vpop.permute.xlu0 %830  ;;  %1489 = vmatpush3.bf16.msra.mxu1 %v843_v15 }
 0x1b5   : > { %v852_v22 = vpack.c.bf16 %v849_v18, %v848_v17  ;;  %v850_v24 = vmul.f32 %v1383_v13, %v831_v20 }
 0x1b6   : > { %v833_v23 = vpop.permute.xlu1 %832 }
 0x1b7   : > { %v851_v25 = vmul.f32 %v1383_v13, %v833_v23  ;;  %1491 = vmatmul.mubr.msk.bf16.vlgmr.msra.gmra.mrb[0].mxu1 %vm875_vm1, %v1577_v19  ;;  %1494 = vmatprep.subr.bf16.mxu1 %v852_v22 }
 0x1b8   : > { %1495 = vmatpush3.bf16.msra.mxu1 %v852_v22  ;;  %1498 = vmatprep.mubr.msk.bf16.mxu1 %vm875_vm1, %v1578_v21 }
 0x1b9   : > { %v853_v26 = vpack.c.bf16 %v851_v25, %v850_v24 }
 0x1bb   : > { %1496 = vmatprep.subr.bf16.mxu1 %v853_v26 }
 0x1bc   : > { %1497 = vmatpush3.bf16.msra.mxu1 %v853_v26 }
 0x1c3   : > { %1499 = vmatmul.mubr.msk.bf16.vlgmr.msra.gmra.mrb[0].mxu1 %vm875_vm1, %v1579_v27 }
 0x1c5   : > { %v1077_v29 = vpop.permute.xlu0 %1076 }
 0x1c7   : > { %v1082_v30 = vpop.permute.xlu1 %1081 }
 0x1c9   : > { %v1087_v31 = vpop.permute.xlu0 %1086 }
 0x1cb   : > { %v1092_v35 = vpop.permute.xlu1 %1091 }
 0x1cd   : > { %v1115_v50 = vpop.permute.xlu0 %1114 }
 0x1cf   : > { %v1120_v55 = vpop.permute.xlu1 %1119 }
 0x1d1   : > { %v1125_v59 = vpop.permute.xlu0 %1124 }
 0x1d3   : > { %v1130_v63 = vpop.permute.xlu1 %1129 }
 0x296   : > { %v1500_v32 = vpop.f32.mrb[0].mxu1 }
 0x297   : > { %v1096_v33 = vadd.f32 %v1500_v32, %v1087_v31  ;;  %v1051_v34 = vpop.f32.mrb[1].mxu1 }
 0x298   : > { %v1094_v36 = vadd.f32 %v1077_v29, %v1051_v34  ;;  %v1501_v37 = vpop.f32.mrb[2].mxu1 }
 0x299   : > { %v1097_v38 = vadd.f32 %v1501_v37, %v1092_v35  ;;  %v1054_v39 = vpop.f32.mrb[3].mxu1  ;;  %v1100_v41 = vmax.f32 %v1096_v33, 0.0 }
 0x29a   : > { %v1095_v40 = vadd.f32 %v1082_v30, %v1054_v39  ;;  %v1098_v43 = vmax.f32 %v1094_v36, 0.0 }
 0x29b   : > { %v1101_v42 = vmax.f32 %v1097_v38, 0.0 }
 0x29c   : > { %v1099_v44 = vmax.f32 %v1095_v40, 0.0 }
 0x29d   : > { %v1103_v45 = vpack.c.bf16 %v1101_v42, %v1100_v41 }
 0x29e   : > { %v1102_v46 = vpack.c.bf16 %v1099_v44, %v1098_v43 }
 0x2a0   : > { %1502 = vmatprep.subr.bf16.mxu0 %v1102_v46 }
 0x2a1   : > { %1503 = vmatpush3.bf16.msra.mxu0 %v1102_v46 }
 0x2a2   : > { %1504 = vmatprep.subr.bf16.mxu0 %v1103_v45 }
 0x2a5   : > { %1505 = vmatpush3.bf16.msra.mxu0 %v1103_v45 }
 0x2a8   : > { %1507 = vmatmul.mubr.msk.bf16.vlgmr.msra.gmra.mrb[4].mxu0 %vm875_vm1, %v1581_v48 }
 0x37b   : > { %v1508_v60 = vpop.f32.mrb[4].mxu0 }
 0x37c   : > { %v1191_v61 = vadd.f32 %v1508_v60, %v1125_v59  ;;  %v1182_v62 = vpop.f32.mrb[5].mxu0 }
 0x37d   : > { %v1183_v0 = vadd.f32 %v1182_v62, %v1115_v50  ;;  %v1509_v1 = vpop.f32.mrb[6].mxu0 }
 0x37e   : > { %v1199_v2 = vadd.f32 %v1191_v61, %v1842_v47  ;;  %v1194_v4 = vadd.f32 %v1509_v1, %v1130_v63  ;;  %v1185_v5 = vpop.f32.mrb[7].mxu0 }
 0x37f   : > { %v1197_v6 = vadd.f32 %v1183_v0, %v1844_v51  ;;  %v1186_v7 = vadd.f32 %v1185_v5, %v1120_v55 }
 0x380   : > { %v1200_v8 = vadd.f32 %v1194_v4, %v1846_v53  ;;  %v1209_v10 = vmul.f32 %v1206_v3, %v1199_v2 }
 0x381   : > { %v1198_v9 = vadd.f32 %v1186_v7, %v1848_v54  ;;  %v1207_v47 = vmul.f32 %v1206_v3, %v1197_v6 }
 0x382   : > { %v1210_v11 = vmul.f32 %v1206_v3, %v1200_v8 }
 0x383   : > { %v1208_v51 = vmul.f32 %v1206_v3, %v1198_v9 }
 0x384   : > { %v1440_v12 = vpack.c.bf16 %v1210_v11, %v1209_v10 }
 0x385   : > { %v1435_v53 = vpack.c.bf16 %v1208_v51, %v1207_v47 }
 0x386   : > { %1443 = vst [vmem:[%s605_s20 + $0x8] sm:$0xff] %v1440_v12  }
 0x387   : > { %1436 = vst [vmem:[%s605_s20] sm:$0xff] %v1435_v53  }
 0x388   : > { %1603 = shalt.err (!%p1600_p7)
}
 0x389   : > { %s1604_s13 = scalar_lea.hbm %s1937_s18, 256  ;;  %s1608_s28 = scalar_lea.hbm %s1993_s12, 512 }
 0x38a   : > { %p1605_p10 = scmp.ne.s32.totalorder %s1937_s18, %s1604_s13  ;;  %p1609_p13 = scmp.lt.u32.totalorder %s1937_s18, %s1993_s12 }
 0x38b   : > { %p1610_p0 = scmp.lt.u32.totalorder %s1608_s28, %s1604_s13  ;;  %p1612_p2 = scmp.lt.u32.totalorder %s1604_s13, %s1937_s18 }
 0x38c   : > { %p1606_p11 = pnand %p1605_p10, %p1769_p6 }
 0x38d   : > { %p1611_p1 = por %p1610_p0, %p1609_p13 }
 0x38e   : > { %p1607_p12 = pneg %p1606_p11 }
 0x38f   : > { %p1613_p3 = por %p1612_p2, %p1611_p1 }
 0x391   : > { %p1614_p4 = pnand %p1613_p3, %p1607_p12 }
 0x393   : > { %1617 = shalt.err (!%p1614_p4)
}
 0x394   : > { %s1658_s25 = smov 64   ;;  %s1659_s27 = smov 128  }
 0x395   : > { %s1660_s0 = smov 4  }
 0x396   : > { %1522 = dma.vmem_to_hbm [thread:$0]  (%p1769_p6), %s1932_s26, 256, %s1937_s18, %s1232_s19, %s1658_s25, %s1659_s27, %s1660_s0  }
 0x397 PF: > { %s1259_s17 = sand.u32 1, %s1640_s21   ;;  %p1525_p5 = pnand %p1359_p9, %p1773_p8 }
 0x398   : > { %s1260_s13 = scalar_lea.sflag [#allocation6], %s1259_s17 }
 0x399   : > { %1635 = dma.done.wait (!%p1525_p5), %s1260_s13, 256  }
 0x39a   : > { %1637 = vsyncadd (!%p1525_p5), %s1260_s13, 4294967040  ;;  %s2006_s24 = sld [smem:[#allocation8_spill]]  ;;  %s2007_s20 = sld [smem:[#allocation9_spill]] }
 0x39b   : > { %s2008_s21 = smov %s1644_s22  ;;  %s2009_s22 = smov %s1648_s23 }
 0x3a0   : > { %p22_p7 = scmp.ge.s32.totalorder %s2006_s24, 4   ;;  %s2010_s23 = smov %s2007_s20 }
 0x3a2   :  { %24 = sbr.rel (!%p22_p7) target bundleno = 5 (0x5), region = 252 }
 0x3a9   :  { %1265 = vsyncpa [#allocation6], 1 }
 0x3aa   :  { %1267 = vsyncpa [#allocation6 + $0x1], 1 }

</bundles_post_ra>
